<compile_context>
chip_gen: v7x
topology: tpu7x:2x2x1
jax: 0.10.0
libtpu: 0.0.40
codegen_flags: <defaults>
</compile_context>

<pallas_src>
import jax
import jax.numpy as jnp
from jax.experimental import pallas as pl
from jax.experimental.pallas import tpu as pltpu

_MAX_LANES = 1024                     # lane-dense last dim (multiple of 128)
_TARGET_BLOCK_BYTES = 4 * 1024 * 1024  # ~4 MiB per pipeline buffer


def _sigmoid_kernel(x_ref, o_ref):
    x = x_ref[...].astype(jnp.float32)
    # Exact sigmoid via one EUP op: sigmoid(x) = 0.5 * tanh(0.5*x) + 0.5.
    # The mul/add stay on the VALU (plenty of slack); kernel remains HBM-bound.
    o_ref[...] = (0.5 * jnp.tanh(0.5 * x) + 0.5).astype(o_ref.dtype)


def _round_up(n, m):
    return ((n + m - 1) // m) * m


def xck_forward(x):
    """Elementwise sigmoid via a tiled, lane-dense Pallas TPU kernel."""
    orig_shape = x.shape
    dtype = x.dtype
    total = int(x.size)
    if total == 0:
        return x

    flat = x.reshape(-1)

    # Pick the largest lane-dense width (multiple of 128, <= 1024) that divides
    # the element count, so no padding copy is needed on the common path.
    lanes = 0
    for cand in (1024, 896, 768, 640, 512, 384, 256, 128):
        if total % cand == 0:
            lanes = cand
            break

    if lanes == 0:
        # Tiny / ragged input: pad the tail up to a 128-lane multiple.
        # Padded elements run through sigmoid (no NaN/Inf) and are sliced off.
        lanes = min(_MAX_LANES, _round_up(total, 128))
        padded_total = _round_up(total, lanes)
        flat = jnp.pad(flat, (0, padded_total - total))
    else:
        padded_total = total

    rows = padded_total // lanes
    x2d = flat.reshape(rows, lanes)

    # dtype-aware block height targeting ~4 MiB per pipeline buffer, rounded
    # to a sublane multiple (8).
    elem_bytes = jnp.dtype(dtype).itemsize
    max_rows = max(8, _TARGET_BLOCK_BYTES // (lanes * elem_bytes))
    max_rows = _round_up(max_rows, 8)

    if rows <= max_rows:
        if rows >= 16:
            # Split into >= 2 blocks so the parallel grid axis can be sharded
            # across v7x's two TensorCores.
            block_rows = _round_up(pl.cdiv(rows, 2), 8)
        else:
            block_rows = rows          # single block == full array dims
    else:
        block_rows = max_rows

    grid = (pl.cdiv(rows, block_rows),)  # ragged final block is masked by Pallas

    out2d = pl.pallas_call(
        _sigmoid_kernel,
        out_shape=jax.ShapeDtypeStruct((rows, lanes), dtype),
        grid=grid,
        in_specs=[pl.BlockSpec((block_rows, lanes), lambda i: (i, 0))],
        out_specs=pl.BlockSpec((block_rows, lanes), lambda i: (i, 0)),
        compiler_params=pltpu.CompilerParams(
            dimension_semantics=("parallel",),
            vmem_limit_bytes=32 << 20),
    )(x2d)

    if padded_total != total:
        return out2d.reshape(-1)[:total].reshape(orig_shape)
    return out2d.reshape(orig_shape)


if __name__ == "__main__":
    key = jax.random.PRNGKey(0)
    k_small, k_large = jax.random.split(key)

    # Small NCHW input consistent with the module's elementwise forward.
    x = jax.random.normal(k_small, (2, 4, 16, 16), dtype=jnp.float32)
    y = xck_forward(x)
    jax.block_until_ready(y)

    # Exact example tensor from the original script:
    # torch.reshape([[1, -0.5], [-1, 3]], (-1, 1, 2, 2)) -> shape (1, 1, 2, 2)
    inp = jnp.array([[1.0, -0.5], [-1.0, 3.0]], dtype=jnp.float32).reshape(-1, 1, 2, 2)
    out = xck_forward(inp)
    jax.block_until_ready(out)

    # A larger input exercising the multi-block pipelined path (grid >= 2).
    xl = jax.random.normal(k_large, (2, 8, 256, 256), dtype=jnp.float32)
    yl = xck_forward(xl)
    jax.block_until_ready(yl)

    assert y.shape == x.shape and out.shape == inp.shape and yl.shape == xl.shape
    assert jnp.allclose(y, jax.nn.sigmoid(x), atol=1e-5), "mismatch on random input"
    assert jnp.allclose(out, jax.nn.sigmoid(inp), atol=1e-5), "mismatch on example tensor"
    assert jnp.allclose(yl, jax.nn.sigmoid(xl), atol=1e-5), "mismatch on large input"

    print("KERNEL_OK")
</pallas_src>

<mosaic_0001>
module attributes {stable_mosaic.version = 11 : i64} {
  func.func @_sigmoid_kernel(%arg0: i32, %arg1: memref<2x1024xf32, #tpu.memory_space<vmem>>, %arg2: memref<2x1024xf32, #tpu.memory_space<vmem>>) attributes {dimension_semantics = [#tpu.dimension_semantics<parallel>], iteration_bounds = array<i64: 1>, scalar_prefetch = 0 : i64, scratch_operands = 0 : i64, tpu.core_type = #tpu.core_type<tc>, window_params = [{transform_indices = @transform_0, window_bounds = array<i64: 2, 1024>}, {transform_indices = @transform_1, window_bounds = array<i64: 2, 1024>}]} {
    %c0 = arith.constant 0 : index
    %c0_0 = arith.constant 0 : index
    %0 = vector.load %arg1[%c0, %c0_0] : memref<2x1024xf32, #tpu.memory_space<vmem>>, vector<2x1024xf32>
    %cst = arith.constant 5.000000e-01 : f32
    %1 = vector.broadcast %cst : f32 to vector<2x1024xf32>
    %2 = arith.mulf %1, %0 : vector<2x1024xf32>
    %3 = math.tanh %2 : vector<2x1024xf32>
    %cst_1 = arith.constant 5.000000e-01 : f32
    %4 = vector.broadcast %cst_1 : f32 to vector<2x1024xf32>
    %5 = arith.mulf %4, %3 : vector<2x1024xf32>
    %cst_2 = arith.constant 5.000000e-01 : f32
    %6 = vector.broadcast %cst_2 : f32 to vector<2x1024xf32>
    %7 = arith.addf %5, %6 : vector<2x1024xf32>
    %c0_3 = arith.constant 0 : index
    %c0_4 = arith.constant 0 : index
    %8 = vector.load %arg2[%c0_3, %c0_4] : memref<2x1024xf32, #tpu.memory_space<vmem>>, vector<2x1024xf32>
    tpu.vector_store %arg2[%c0_3, %c0_4], %7 {strides = array<i32>} : memref<2x1024xf32, #tpu.memory_space<vmem>>, vector<2x1024xf32>,
    return
  }
  func.func @transform_0(%arg0: i32) -> (i32, i32) {
    %c0_i32 = arith.constant 0 : i32
    %c0_i32_0 = arith.constant 0 : i32
    return %arg0, %c0_i32 : i32, i32
  }
  func.func @transform_1(%arg0: i32) -> (i32, i32) {
    %c0_i32 = arith.constant 0 : i32
    %c0_i32_0 = arith.constant 0 : i32
    return %arg0, %c0_i32 : i32, i32
  }
}

</mosaic_0001>

<bundles_post_ra>
// kernel: tpu_custom_call.1
= control target key start
LH: loop header
LB: loop body
LE: loop exit
PB: predicated region body
PF: predicated region fallthrough
CT: control target
= control target key end

     0   :  { %6 = vsyncpa [#allocation3], 0  ;;  %s138_s0 = inlined_call_operand.hbm [shape: f32[2,1024], index: 0, kind: input, shape index: {}]   ;;  %s139_s1 = inlined_call_operand.hbm [shape: f32[2,1024], index: 1, kind: output, shape index: {}]  }
   0x1   :  { %7 = vsyncpa [#allocation4], 0  ;;  %s102_s6 = smov [#allocation2]   ;;  %s54_s10 = scalar_lea.hbm %s138_s0, 256 }
   0x2   :  { %s14_s7 = sshll.u32 %s102_s6, 4  ;;  %p55_p0 = scmp.ne.s32.totalorder %s138_s0, %s54_s10  ;;  %s15_s7 = int_to_ptr.vmem [resolvable:$true] %s14_s7 }
   0x3   :  { %p58_p1 = scmp.lt.u32.totalorder %s54_s10, %s138_s0 }
   0x5   :  { %p60_p2 = pnand %p58_p1, %p55_p0 }
   0x7   :  { %63 = shalt.err (!%p60_p2)
}
   0x8   :  { %s64_s15 = scalar_lea.vmem %s15_s7, 256  ;;  %p69_p4 = scmp.lt.s32.totalorder %s15_s7, %s15_s7 }
   0x9   :  { %p65_p3 = scmp.ne.s32.totalorder %s15_s7, %s64_s15  ;;  %p70_p5 = scmp.lt.s32.totalorder %s64_s15, %s64_s15 }
   0xb   :  { %p71_p6 = por %p70_p5, %p69_p4 }
   0xd   :  { %p72_p7 = pnand %p71_p6, %p65_p3 }
   0xf   :  { %75 = shalt.err (!%p72_p7)
}
  0x10   :  { %17 = dma.hbm_to_vmem [thread:$0]  %s138_s0, 256, %s15_s7, [#allocation3]  }
  0x11   :  { %98 = dma.done.wait [#allocation3], 256  }
  0x12   :  { %99 = vsyncadd [#allocation3], 4294967040  ;;  %v21_v0 = vld [vmem:[#allocation2] sm:$0xff]  ;;  %v22_v1 = vld [vmem:[#allocation2 + $0x8] sm:$0xff]  ;;  %s103_s18 = smov [#allocation5]  }
  0x13   :  { %v23_v2 = vmul.f32 0.5, %v21_v0  ;;  %v24_v3 = vmul.f32 0.5, %v22_v1  ;;  %s39_s19 = sshll.u32 %s103_s18, 4  ;;  %s40_s19 = int_to_ptr.vmem [resolvable:$true] %s39_s19 }
  0x14   :  { %s76_s0 = scalar_lea.vmem %s40_s19, 256  ;;  %p81_p9 = scmp.lt.s32.totalorder %s40_s19, %s40_s19 }
  0x15   :  { %50 = vtanh.f32 %v23_v2  ;;  %p77_p8 = scmp.ne.s32.totalorder %s40_s19, %s76_s0  ;;  %p82_p10 = scmp.lt.s32.totalorder %s76_s0, %s76_s0 }
  0x16   :  { %52 = vtanh.f32 %v24_v3 }
  0x17   :  { %p83_p11 = por %p82_p10, %p81_p9 }
  0x19   :  { %p84_p12 = pnand %p83_p11, %p77_p8 }
  0x1f   :  { %v51_v4 = vpop.eup %50 }
  0x20   :  { %v53_v5 = vpop.eup %52  ;;  %v27_v6 = vmul.f32 0.5, %v51_v4 }
  0x21   :  { %v28_v7 = vmul.f32 0.5, %v53_v5 }
  0x22   :  { %v29_v8 = vadd.f32 0.5, %v27_v6 }
  0x23   :  { %v30_v9 = vadd.f32 0.5, %v28_v7 }
  0x24   :  { %31 = vst [vmem:[#allocation5] sm:$0xff] %v29_v8 }
  0x25   :  { %32 = vst [vmem:[#allocation5 + $0x8] sm:$0xff] %v30_v9 }
  0x26   :  { %87 = shalt.err (!%p84_p12)
}
  0x27   :  { %s88_s22 = scalar_lea.hbm %s139_s1, 256 }
  0x28   :  { %p89_p13 = scmp.ne.s32.totalorder %s139_s1, %s88_s22  ;;  %p92_p0 = scmp.lt.u32.totalorder %s88_s22, %s139_s1 }
  0x2a   :  { %p94_p1 = pnand %p92_p0, %p89_p13 }
  0x2c   :  { %97 = shalt.err (!%p94_p1)
}
  0x2d   :  { %42 = dma.vmem_to_hbm [thread:$0]  %s40_s19, 256, %s139_s1, [#allocation4]  }
  0x2e   :  { %100 = dma.done.wait [#allocation4], 256  }
  0x2f   :  { %101 = vsyncadd [#allocation4], 4294967040 }
  0x30   :  { %46 = vsyncpa [#allocation3], 1 }
  0x31   :  { %47 = vsyncpa [#allocation4], 1 }

</bundles_post_ra>
